<compile_context>
chip_gen: v7x
topology: tpu7x:2x2x1
jax: 0.10.0
libtpu: 0.0.40
codegen_flags: <defaults>
</compile_context>

<pallas_src>
import functools

import jax
import jax.numpy as jnp
from jax.experimental import pallas as pl
from jax.experimental.pallas import tpu as pltpu


def _bc_lstm_kernel(x_ref, wih_ref, whh_ref, b_ref, wfc_ref, bfc_ref, out_ref,
                    h_scratch, *, seq_len, batch, hidden_dim):
    T, B, H = seq_len, batch, hidden_dim

    # --- hoisted input projection: one (T*B, D) @ (D, 4H) MXU matmul ------
    # bf16 operands, f32 accumulate; bias (b_ih + b_hh) added in f32.
    gx = jnp.dot(x_ref[...], wih_ref[...],
                 preferred_element_type=jnp.float32)
    gx = gx + b_ref[...]                              # (T*B, 4H) f32, time-major

    whh = whh_ref[...]                                # (H, 4H) bf16

    # --- serial recurrence: only h @ W_hh^T on the critical path ----------
    h = jnp.zeros((B, H), jnp.float32)
    c = jnp.zeros((B, H), jnp.float32)
    for t in range(T):                                # static unroll; static slices
        gates = gx[t * B:(t + 1) * B, :] + jnp.dot(
            h.astype(whh.dtype), whh, preferred_element_type=jnp.float32)
        # 2 full-vreg EUP pushes instead of 4 quarter-lane ones.
        s = jax.nn.sigmoid(gates)                     # holds i, f, -, o quarters
        tg = jnp.tanh(gates)                          # holds the g quarter
        i_g = s[:, 0 * H:1 * H]
        f_g = s[:, 1 * H:2 * H]
        g_g = tg[:, 2 * H:3 * H]
        o_g = s[:, 3 * H:4 * H]
        c = f_g * c + i_g * g_g                       # state math stays f32
        h = o_g * jnp.tanh(c)
        h_scratch[t * B:(t + 1) * B, :] = h.astype(h_scratch.dtype)

    # --- FC head hoisted out of the loop: one matmul + single store -------
    y = jnp.dot(h_scratch[...], wfc_ref[...],
                preferred_element_type=jnp.float32) + bfc_ref[...]
    out_ref[...] = y.astype(out_ref.dtype)            # (T*B, A)


@jax.jit
def behavior_cloning_lstm(x, params):
    """x: (B, T, state_dim) float32 -> (B, T, action_dim) float32."""
    w_ih, w_hh, b_ih, b_hh, w_fc, b_fc = (
        params["w_ih"], params["w_hh"], params["b_ih"],
        params["b_hh"], params["w_fc"], params["b_fc"])

    B, T, D = x.shape
    H = w_hh.shape[1]
    A = w_fc.shape[0]

    # Time-major, 2-D, bf16 matmul operands (prepared once, in XLA).
    x_tm = jnp.transpose(x, (1, 0, 2)).reshape(T * B, D).astype(jnp.bfloat16)
    wih_t = w_ih.T.astype(jnp.bfloat16)               # (D, 4H)
    whh_t = w_hh.T.astype(jnp.bfloat16)               # (H, 4H)
    bias = (b_ih + b_hh).reshape(1, 4 * H)            # (1, 4H) f32
    wfc_t = w_fc.T.astype(jnp.bfloat16)               # (H, A)
    bfc = b_fc.reshape(1, A)                          # (1, A) f32

    kernel = functools.partial(
        _bc_lstm_kernel, seq_len=T, batch=B, hidden_dim=H)

    vmem_spec = pl.BlockSpec(memory_space=pltpu.MemorySpace.VMEM)
    y = pl.pallas_call(
        kernel,
        out_shape=jax.ShapeDtypeStruct((T * B, A), x.dtype),
        in_specs=[vmem_spec] * 6,                     # whole arrays resident in VMEM
        out_specs=vmem_spec,
        scratch_shapes=[pltpu.VMEM((T * B, H), jnp.bfloat16)],
        compiler_params=pltpu.CompilerParams(
            vmem_limit_bytes=32 * 1024 * 1024),       # explicit budget for scaling H
    )(x_tm, wih_t, whh_t, bias, wfc_t, bfc)

    # Back to batch-major (B, T, A) — pure layout, done by XLA.
    return jnp.transpose(y.reshape(T, B, A), (1, 0, 2))


def reference_lstm(x, params):
    """Pure-JAX f32 reference matching torch.nn.LSTM + Linear semantics."""
    w_ih, w_hh, b_ih, b_hh, w_fc, b_fc = (
        params["w_ih"], params["w_hh"], params["b_ih"],
        params["b_hh"], params["w_fc"], params["b_fc"])
    B, T, D = x.shape
    H = w_hh.shape[1]

    def step(carry, x_t):
        h, c = carry
        gates = x_t @ w_ih.T + b_ih + h @ w_hh.T + b_hh
        i = jax.nn.sigmoid(gates[:, 0 * H:1 * H])
        f = jax.nn.sigmoid(gates[:, 1 * H:2 * H])
        g = jnp.tanh(gates[:, 2 * H:3 * H])
        o = jax.nn.sigmoid(gates[:, 3 * H:4 * H])
        c = f * c + i * g
        h = o * jnp.tanh(c)
        return (h, c), h

    h0 = jnp.zeros((B, H), jnp.float32)
    c0 = jnp.zeros((B, H), jnp.float32)
    _, hs = jax.lax.scan(step, (h0, c0), jnp.transpose(x, (1, 0, 2)))
    hs = jnp.transpose(hs, (1, 0, 2))                 # (B, T, H)
    return hs @ w_fc.T + b_fc


def init_params(key, state_dim, action_dim, hidden_dim):
    """Deterministic init mimicking torch's U(-1/sqrt(H), 1/sqrt(H))."""
    ks = jax.random.split(key, 6)
    bound = 1.0 / jnp.sqrt(hidden_dim)
    u = lambda k, shape: jax.random.uniform(
        k, shape, jnp.float32, minval=-bound, maxval=bound)
    return {
        "w_ih": u(ks[0], (4 * hidden_dim, state_dim)),
        "w_hh": u(ks[1], (4 * hidden_dim, hidden_dim)),
        "b_ih": u(ks[2], (4 * hidden_dim,)),
        "b_hh": u(ks[3], (4 * hidden_dim,)),
        "w_fc": u(ks[4], (action_dim, hidden_dim)),
        "b_fc": u(ks[5], (action_dim,)),
    }


if __name__ == "__main__":
    B, T, STATE_DIM, ACTION_DIM, HIDDEN_DIM = 2, 8, 16, 8, 32

    key = jax.random.PRNGKey(0)
    k_x, k_p = jax.random.split(key)
    x = jax.random.normal(k_x, (B, T, STATE_DIM), jnp.float32)
    params = init_params(k_p, STATE_DIM, ACTION_DIM, HIDDEN_DIM)

    out = behavior_cloning_lstm(x, params)
    out = jax.block_until_ready(out)

    ref = jax.block_until_ready(reference_lstm(x, params))
    assert out.shape == (B, T, ACTION_DIM)
    # Tolerance loosened vs the all-f32 version: matmul operands are bf16
    # (f32 accumulate / f32 state math), per the perf review.
    assert jnp.allclose(out, ref, atol=5e-2, rtol=5e-2), "mismatch vs reference"

    print("KERNEL_OK")
</pallas_src>

<mosaic_0001>
module attributes {stable_mosaic.version = 11 : i64} {
  func.func @_bc_lstm_kernel(%arg0: memref<16x16xbf16, #tpu.memory_space<vmem>>, %arg1: memref<16x128xbf16, #tpu.memory_space<vmem>>, %arg2: memref<32x128xbf16, #tpu.memory_space<vmem>>, %arg3: memref<1x128xf32, #tpu.memory_space<vmem>>, %arg4: memref<32x8xbf16, #tpu.memory_space<vmem>>, %arg5: memref<1x8xf32, #tpu.memory_space<vmem>>, %arg6: memref<16x8xf32, #tpu.memory_space<vmem>>, %arg7: memref<16x32xbf16, #tpu.memory_space<vmem>>) attributes {dimension_semantics = [], scalar_prefetch = 0 : i64, scratch_operands = 1 : i64, tpu.core_type = #tpu.core_type<tc>} {
    %c0 = arith.constant 0 : index
    %c0_0 = arith.constant 0 : index
    %0 = vector.load %arg0[%c0, %c0_0] : memref<16x16xbf16, #tpu.memory_space<vmem>>, vector<16x16xbf16>
    %c0_1 = arith.constant 0 : index
    %c0_2 = arith.constant 0 : index
    %1 = vector.load %arg1[%c0_1, %c0_2] : memref<16x128xbf16, #tpu.memory_space<vmem>>, vector<16x128xbf16>
    %cst = arith.constant dense<0.000000e+00> : vector<16x128xf32>
    %2 = tpu.matmul %0, %1, %cst {dimension_numbers = #tpu.dot_dimension_numbers<[1], [0], [0], [1], [0, 0, 1, 1], [], []>} : vector<16x16xbf16>, vector<16x128xbf16>, vector<16x128xf32> -> vector<16x128xf32>
    %c0_3 = arith.constant 0 : index
    %c0_4 = arith.constant 0 : index
    %3 = vector.load %arg3[%c0_3, %c0_4] : memref<1x128xf32, #tpu.memory_space<vmem>>, vector<1x128xf32>
    %4 = vector.broadcast %3 : vector<1x128xf32> to vector<16x128xf32>
    %5 = arith.addf %2, %4 : vector<16x128xf32>
    %c0_5 = arith.constant 0 : index
    %c0_6 = arith.constant 0 : index
    %6 = vector.load %arg2[%c0_5, %c0_6] : memref<32x128xbf16, #tpu.memory_space<vmem>>, vector<32x128xbf16>
    %cst_7 = arith.constant 0.000000e+00 : f32
    %7 = vector.broadcast %cst_7 : f32 to vector<2x32xf32>
    %cst_8 = arith.constant 0.000000e+00 : f32
    %8 = vector.broadcast %cst_8 : f32 to vector<2x32xf32>
    %9 = vector.extract_strided_slice %5 {offsets = [0, 0], sizes = [2, 128], strides = [1, 1]} : vector<16x128xf32> to vector<2x128xf32>
    %10 = arith.truncf %7 : vector<2x32xf32> to vector<2x32xbf16>
    %cst_9 = arith.constant dense<0.000000e+00> : vector<2x128xf32>
    %11 = tpu.matmul %10, %6, %cst_9 {dimension_numbers = #tpu.dot_dimension_numbers<[1], [0], [0], [1], [0, 0, 1, 1], [], []>} : vector<2x32xbf16>, vector<32x128xbf16>, vector<2x128xf32> -> vector<2x128xf32>
    %12 = arith.addf %9, %11 : vector<2x128xf32>
    %13 = arith.negf %12 : vector<2x128xf32>
    %14 = math.exp %13 : vector<2x128xf32>
    %cst_10 = arith.constant 1.000000e+00 : f32
    %15 = vector.broadcast %cst_10 : f32 to vector<2x128xf32>
    %16 = arith.addf %15, %14 : vector<2x128xf32>
    %17 = arith.divf %15, %16 : vector<2x128xf32>
    %18 = math.tanh %12 : vector<2x128xf32>
    %19 = vector.extract_strided_slice %17 {offsets = [0, 0], sizes = [2, 32], strides = [1, 1]} : vector<2x128xf32> to vector<2x32xf32>
    %20 = vector.extract_strided_slice %17 {offsets = [0, 32], sizes = [2, 32], strides = [1, 1]} : vector<2x128xf32> to vector<2x32xf32>
    %21 = vector.extract_strided_slice %18 {offsets = [0, 64], sizes = [2, 32], strides = [1, 1]} : vector<2x128xf32> to vector<2x32xf32>
    %22 = vector.extract_strided_slice %17 {offsets = [0, 96], sizes = [2, 32], strides = [1, 1]} : vector<2x128xf32> to vector<2x32xf32>
    %23 = arith.mulf %20, %8 : vector<2x32xf32>
    %24 = arith.mulf %19, %21 : vector<2x32xf32>
    %25 = arith.addf %23, %24 : vector<2x32xf32>
    %26 = math.tanh %25 : vector<2x32xf32>
    %27 = arith.mulf %22, %26 : vector<2x32xf32>
    %28 = arith.truncf %27 : vector<2x32xf32> to vector<2x32xbf16>
    %c0_11 = arith.constant 0 : index
    %c0_12 = arith.constant 0 : index
    %29 = vector.load %arg7[%c0_11, %c0_12] : memref<16x32xbf16, #tpu.memory_space<vmem>>, vector<2x32xbf16>
    tpu.vector_store %arg7[%c0_11, %c0_12], %28 {strides = array<i32>} : memref<16x32xbf16, #tpu.memory_space<vmem>>, vector<2x32xbf16>,
    %30 = vector.extract_strided_slice %5 {offsets = [2, 0], sizes = [2, 128], strides = [1, 1]} : vector<16x128xf32> to vector<2x128xf32>
    %31 = arith.truncf %27 : vector<2x32xf32> to vector<2x32xbf16>
    %cst_13 = arith.constant dense<0.000000e+00> : vector<2x128xf32>
    %32 = tpu.matmul %31, %6, %cst_13 {dimension_numbers = #tpu.dot_dimension_numbers<[1], [0], [0], [1], [0, 0, 1, 1], [], []>} : vector<2x32xbf16>, vector<32x128xbf16>, vector<2x128xf32> -> vector<2x128xf32>
    %33 = arith.addf %30, %32 : vector<2x128xf32>
    %34 = arith.negf %33 : vector<2x128xf32>
    %35 = math.exp %34 : vector<2x128xf32>
    %cst_14 = arith.constant 1.000000e+00 : f32
    %36 = vector.broadcast %cst_14 : f32 to vector<2x128xf32>
    %37 = arith.addf %36, %35 : vector<2x128xf32>
    %38 = arith.divf %36, %37 : vector<2x128xf32>
    %39 = math.tanh %33 : vector<2x128xf32>
    %40 = vector.extract_strided_slice %38 {offsets = [0, 0], sizes = [2, 32], strides = [1, 1]} : vector<2x128xf32> to vector<2x32xf32>
    %41 = vector.extract_strided_slice %38 {offsets = [0, 32], sizes = [2, 32], strides = [1, 1]} : vector<2x128xf32> to vector<2x32xf32>
    %42 = vector.extract_strided_slice %39 {offsets = [0, 64], sizes = [2, 32], strides = [1, 1]} : vector<2x128xf32> to vector<2x32xf32>
    %43 = vector.extract_strided_slice %38 {offsets = [0, 96], sizes = [2, 32], strides = [1, 1]} : vector<2x128xf32> to vector<2x32xf32>
    %44 = arith.mulf %41, %25 : vector<2x32xf32>
    %45 = arith.mulf %40, %42 : vector<2x32xf32>
    %46 = arith.addf %44, %45 : vector<2x32xf32>
    %47 = math.tanh %46 : vector<2x32xf32>
    %48 = arith.mulf %43, %47 : vector<2x32xf32>
    %49 = arith.truncf %48 : vector<2x32xf32> to vector<2x32xbf16>
    %c2 = arith.constant 2 : index
    %c0_15 = arith.constant 0 : index
    %50 = vector.load %arg7[%c2, %c0_15] : memref<16x32xbf16, #tpu.memory_space<vmem>>, vector<2x32xbf16>
    tpu.vector_store %arg7[%c2, %c0_15], %49 {strides = array<i32>} : memref<16x32xbf16, #tpu.memory_space<vmem>>, vector<2x32xbf16>,
    %51 = vector.extract_strided_slice %5 {offsets = [4, 0], sizes = [2, 128], strides = [1, 1]} : vector<16x128xf32> to vector<2x128xf32>
    %52 = arith.truncf %48 : vector<2x32xf32> to vector<2x32xbf16>
    %cst_16 = arith.constant dense<0.000000e+00> : vector<2x128xf32>
    %53 = tpu.matmul %52, %6, %cst_16 {dimension_numbers = #tpu.dot_dimension_numbers<[1], [0], [0], [1], [0, 0, 1, 1], [], []>} : vector<2x32xbf16>, vector<32x128xbf16>, vector<2x128xf32> -> vector<2x128xf32>
    %54 = arith.addf %51, %53 : vector<2x128xf32>
    %55 = arith.negf %54 : vector<2x128xf32>
    %56 = math.exp %55 : vector<2x128xf32>
    %cst_17 = arith.constant 1.000000e+00 : f32
    %57 = vector.broadcast %cst_17 : f32 to vector<2x128xf32>
    %58 = arith.addf %57, %56 : vector<2x128xf32>
    %59 = arith.divf %57, %58 : vector<2x128xf32>
    %60 = math.tanh %54 : vector<2x128xf32>
    %61 = vector.extract_strided_slice %59 {offsets = [0, 0], sizes = [2, 32], strides = [1, 1]} : vector<2x128xf32> to vector<2x32xf32>
    %62 = vector.extract_strided_slice %59 {offsets = [0, 32], sizes = [2, 32], strides = [1, 1]} : vector<2x128xf32> to vector<2x32xf32>
    %63 = vector.extract_strided_slice %60 {offsets = [0, 64], sizes = [2, 32], strides = [1, 1]} : vector<2x128xf32> to vector<2x32xf32>
    %64 = vector.extract_strided_slice %59 {offsets = [0, 96], sizes = [2, 32], strides = [1, 1]} : vector<2x128xf32> to vector<2x32xf32>
    %65 = arith.mulf %62, %46 : vector<2x32xf32>
    %66 = arith.mulf %61, %63 : vector<2x32xf32>
    %67 = arith.addf %65, %66 : vector<2x32xf32>
    %68 = math.tanh %67 : vector<2x32xf32>
    %69 = arith.mulf %64, %68 : vector<2x32xf32>
    %70 = arith.truncf %69 : vector<2x32xf32> to vector<2x32xbf16>
    %c4 = arith.constant 4 : index
    %c0_18 = arith.constant 0 : index
    %71 = vector.load %arg7[%c4, %c0_18] : memref<16x32xbf16, #tpu.memory_space<vmem>>, vector<2x32xbf16>
    tpu.vector_store %arg7[%c4, %c0_18], %70 {strides = array<i32>} : memref<16x32xbf16, #tpu.memory_space<vmem>>, vector<2x32xbf16>,
    %72 = vector.extract_strided_slice %5 {offsets = [6, 0], sizes = [2, 128], strides = [1, 1]} : vector<16x128xf32> to vector<2x128xf32>
    %73 = arith.truncf %69 : vector<2x32xf32> to vector<2x32xbf16>
    %cst_19 = arith.constant dense<0.000000e+00> : vector<2x128xf32>
    %74 = tpu.matmul %73, %6, %cst_19 {dimension_numbers = #tpu.dot_dimension_numbers<[1], [0], [0], [1], [0, 0, 1, 1], [], []>} : vector<2x32xbf16>, vector<32x128xbf16>, vector<2x128xf32> -> vector<2x128xf32>
    %75 = arith.addf %72, %74 : vector<2x128xf32>
    %76 = arith.negf %75 : vector<2x128xf32>
    %77 = math.exp %76 : vector<2x128xf32>
    %cst_20 = arith.constant 1.000000e+00 : f32
    %78 = vector.broadcast %cst_20 : f32 to vector<2x128xf32>
    %79 = arith.addf %78, %77 : vector<2x128xf32>
    %80 = arith.divf %78, %79 : vector<2x128xf32>
    %81 = math.tanh %75 : vector<2x128xf32>
    %82 = vector.extract_strided_slice %80 {offsets = [0, 0], sizes = [2, 32], strides = [1, 1]} : vector<2x128xf32> to vector<2x32xf32>
    %83 = vector.extract_strided_slice %80 {offsets = [0, 32], sizes = [2, 32], strides = [1, 1]} : vector<2x128xf32> to vector<2x32xf32>
    %84 = vector.extract_strided_slice %81 {offsets = [0, 64], sizes = [2, 32], strides = [1, 1]} : vector<2x128xf32> to vector<2x32xf32>
    %85 = vector.extract_strided_slice %80 {offsets = [0, 96], sizes = [2, 32], strides = [1, 1]} : vector<2x128xf32> to vector<2x32xf32>
    %86 = arith.mulf %83, %67 : vector<2x32xf32>
    %87 = arith.mulf %82, %84 : vector<2x32xf32>
    %88 = arith.addf %86, %87 : vector<2x32xf32>
    %89 = math.tanh %88 : vector<2x32xf32>
    %90 = arith.mulf %85, %89 : vector<2x32xf32>
    %91 = arith.truncf %90 : vector<2x32xf32> to vector<2x32xbf16>
    %c6 = arith.constant 6 : index
    %c0_21 = arith.constant 0 : index
    %92 = vector.load %arg7[%c6, %c0_21] : memref<16x32xbf16, #tpu.memory_space<vmem>>, vector<2x32xbf16>
    tpu.vector_store %arg7[%c6, %c0_21], %91 {strides = array<i32>} : memref<16x32xbf16, #tpu.memory_space<vmem>>, vector<2x32xbf16>,
    %93 = vector.extract_strided_slice %5 {offsets = [8, 0], sizes = [2, 128], strides = [1, 1]} : vector<16x128xf32> to vector<2x128xf32>
    %94 = arith.truncf %90 : vector<2x32xf32> to vector<2x32xbf16>
    %cst_22 = arith.constant dense<0.000000e+00> : vector<2x128xf32>
    %95 = tpu.matmul %94, %6, %cst_22 {dimension_numbers = #tpu.dot_dimension_numbers<[1], [0], [0], [1], [0, 0, 1, 1], [], []>} : vector<2x32xbf16>, vector<32x128xbf16>, vector<2x128xf32> -> vector<2x128xf32>
    %96 = arith.addf %93, %95 : vector<2x128xf32>
    %97 = arith.negf %96 : vector<2x128xf32>
    %98 = math.exp %97 : vector<2x128xf32>
    %cst_23 = arith.constant 1.000000e+00 : f32
    %99 = vector.broadcast %cst_23 : f32 to vector<2x128xf32>
    %100 = arith.addf %99, %98 : vector<2x128xf32>
    %101 = arith.divf %99, %100 : vector<2x128xf32>
    %102 = math.tanh %96 : vector<2x128xf32>
    %103 = vector.extract_strided_slice %101 {offsets = [0, 0], sizes = [2, 32], strides = [1, 1]} : vector<2x128xf32> to vector<2x32xf32>
    %104 = vector.extract_strided_slice %101 {offsets = [0, 32], sizes = [2, 32], strides = [1, 1]} : vector<2x128xf32> to vector<2x32xf32>
    %105 = vector.extract_strided_slice %102 {offsets = [0, 64], sizes = [2, 32], strides = [1, 1]} : vector<2x128xf32> to vector<2x32xf32>
    %106 = vector.extract_strided_slice %101 {offsets = [0, 96], sizes = [2, 32], strides = [1, 1]} : vector<2x128xf32> to vector<2x32xf32>
    %107 = arith.mulf %104, %88 : vector<2x32xf32>
    %108 = arith.mulf %103, %105 : vector<2x32xf32>
    %109 = arith.addf %107, %108 : vector<2x32xf32>
    %110 = math.tanh %109 : vector<2x32xf32>
    %111 = arith.mulf %106, %110 : vector<2x32xf32>
    %112 = arith.truncf %111 : vector<2x32xf32> to vector<2x32xbf16>
    %c8 = arith.constant 8 : index
    %c0_24 = arith.constant 0 : index
    %113 = vector.load %arg7[%c8, %c0_24] : memref<16x32xbf16, #tpu.memory_space<vmem>>, vector<2x32xbf16>
    tpu.vector_store %arg7[%c8, %c0_24], %112 {strides = array<i32>} : memref<16x32xbf16, #tpu.memory_space<vmem>>, vector<2x32xbf16>,
    %114 = vector.extract_strided_slice %5 {offsets = [10, 0], sizes = [2, 128], strides = [1, 1]} : vector<16x128xf32> to vector<2x128xf32>
    %115 = arith.truncf %111 : vector<2x32xf32> to vector<2x32xbf16>
    %cst_25 = arith.constant dense<0.000000e+00> : vector<2x128xf32>
    %116 = tpu.matmul %115, %6, %cst_25 {dimension_numbers = #tpu.dot_dimension_numbers<[1], [0], [0], [1], [0, 0, 1, 1], [], []>} : vector<2x32xbf16>, vector<32x128xbf16>, vector<2x128xf32> -> vector<2x128xf32>
    %117 = arith.addf %114, %116 : vector<2x128xf32>
    %118 = arith.negf %117 : vector<2x128xf32>
    %119 = math.exp %118 : vector<2x128xf32>
    %cst_26 = arith.constant 1.000000e+00 : f32
    %120 = vector.broadcast %cst_26 : f32 to vector<2x128xf32>
    %121 = arith.addf %120, %119 : vector<2x128xf32>
    %122 = arith.divf %120, %121 : vector<2x128xf32>
    %123 = math.tanh %117 : vector<2x128xf32>
    %124 = vector.extract_strided_slice %122 {offsets = [0, 0], sizes = [2, 32], strides = [1, 1]} : vector<2x128xf32> to vector<2x32xf32>
    %125 = vector.extract_strided_slice %122 {offsets = [0, 32], sizes = [2, 32], strides = [1, 1]} : vector<2x128xf32> to vector<2x32xf32>
    %126 = vector.extract_strided_slice %123 {offsets = [0, 64], sizes = [2, 32], strides = [1, 1]} : vector<2x128xf32> to vector<2x32xf32>
    %127 = vector.extract_strided_slice %122 {offsets = [0, 96], sizes = [2, 32], strides = [1, 1]} : vector<2x128xf32> to vector<2x32xf32>
    %128 = arith.mulf %125, %109 : vector<2x32xf32>
    %129 = arith.mulf %124, %126 : vector<2x32xf32>
    %130 = arith.addf %128, %129 : vector<2x32xf32>
    %131 = math.tanh %130 : vector<2x32xf32>
    %132 = arith.mulf %127, %131 : vector<2x32xf32>
    %133 = arith.truncf %132 : vector<2x32xf32> to vector<2x32xbf16>
    %c10 = arith.constant 10 : index
    %c0_27 = arith.constant 0 : index
    %134 = vector.load %arg7[%c10, %c0_27] : memref<16x32xbf16, #tpu.memory_space<vmem>>, vector<2x32xbf16>
    tpu.vector_store %arg7[%c10, %c0_27], %133 {strides = array<i32>} : memref<16x32xbf16, #tpu.memory_space<vmem>>, vector<2x32xbf16>,
    %135 = vector.extract_strided_slice %5 {offsets = [12, 0], sizes = [2, 128], strides = [1, 1]} : vector<16x128xf32> to vector<2x128xf32>
    %136 = arith.truncf %132 : vector<2x32xf32> to vector<2x32xbf16>
    %cst_28 = arith.constant dense<0.000000e+00> : vector<2x128xf32>
    %137 = tpu.matmul %136, %6, %cst_28 {dimension_numbers = #tpu.dot_dimension_numbers<[1], [0], [0], [1], [0, 0, 1, 1], [], []>} : vector<2x32xbf16>, vector<32x128xbf16>, vector<2x128xf32> -> vector<2x128xf32>
    %138 = arith.addf %135, %137 : vector<2x128xf32>
    %139 = arith.negf %138 : vector<2x128xf32>
    %140 = math.exp %139 : vector<2x128xf32>
    %cst_29 = arith.constant 1.000000e+00 : f32
    %141 = vector.broadcast %cst_29 : f32 to vector<2x128xf32>
    %142 = arith.addf %141, %140 : vector<2x128xf32>
    %143 = arith.divf %141, %142 : vector<2x128xf32>
    %144 = math.tanh %138 : vector<2x128xf32>
    %145 = vector.extract_strided_slice %143 {offsets = [0, 0], sizes = [2, 32], strides = [1, 1]} : vector<2x128xf32> to vector<2x32xf32>
    %146 = vector.extract_strided_slice %143 {offsets = [0, 32], sizes = [2, 32], strides = [1, 1]} : vector<2x128xf32> to vector<2x32xf32>
    %147 = vector.extract_strided_slice %144 {offsets = [0, 64], sizes = [2, 32], strides = [1, 1]} : vector<2x128xf32> to vector<2x32xf32>
    %148 = vector.extract_strided_slice %143 {offsets = [0, 96], sizes = [2, 32], strides = [1, 1]} : vector<2x128xf32> to vector<2x32xf32>
    %149 = arith.mulf %146, %130 : vector<2x32xf32>
    %150 = arith.mulf %145, %147 : vector<2x32xf32>
    %151 = arith.addf %149, %150 : vector<2x32xf32>
    %152 = math.tanh %151 : vector<2x32xf32>
    %153 = arith.mulf %148, %152 : vector<2x32xf32>
    %154 = arith.truncf %153 : vector<2x32xf32> to vector<2x32xbf16>
    %c12 = arith.constant 12 : index
    %c0_30 = arith.constant 0 : index
    %155 = vector.load %arg7[%c12, %c0_30] : memref<16x32xbf16, #tpu.memory_space<vmem>>, vector<2x32xbf16>
    tpu.vector_store %arg7[%c12, %c0_30], %154 {strides = array<i32>} : memref<16x32xbf16, #tpu.memory_space<vmem>>, vector<2x32xbf16>,
    %156 = vector.extract_strided_slice %5 {offsets = [14, 0], sizes = [2, 128], strides = [1, 1]} : vector<16x128xf32> to vector<2x128xf32>
    %157 = arith.truncf %153 : vector<2x32xf32> to vector<2x32xbf16>
    %cst_31 = arith.constant dense<0.000000e+00> : vector<2x128xf32>
    %158 = tpu.matmul %157, %6, %cst_31 {dimension_numbers = #tpu.dot_dimension_numbers<[1], [0], [0], [1], [0, 0, 1, 1], [], []>} : vector<2x32xbf16>, vector<32x128xbf16>, vector<2x128xf32> -> vector<2x128xf32>
    %159 = arith.addf %156, %158 : vector<2x128xf32>
    %160 = arith.negf %159 : vector<2x128xf32>
    %161 = math.exp %160 : vector<2x128xf32>
    %cst_32 = arith.constant 1.000000e+00 : f32
    %162 = vector.broadcast %cst_32 : f32 to vector<2x128xf32>
    %163 = arith.addf %162, %161 : vector<2x128xf32>
    %164 = arith.divf %162, %163 : vector<2x128xf32>
    %165 = math.tanh %159 : vector<2x128xf32>
    %166 = vector.extract_strided_slice %164 {offsets = [0, 0], sizes = [2, 32], strides = [1, 1]} : vector<2x128xf32> to vector<2x32xf32>
    %167 = vector.extract_strided_slice %164 {offsets = [0, 32], sizes = [2, 32], strides = [1, 1]} : vector<2x128xf32> to vector<2x32xf32>
    %168 = vector.extract_strided_slice %165 {offsets = [0, 64], sizes = [2, 32], strides = [1, 1]} : vector<2x128xf32> to vector<2x32xf32>
    %169 = vector.extract_strided_slice %164 {offsets = [0, 96], sizes = [2, 32], strides = [1, 1]} : vector<2x128xf32> to vector<2x32xf32>
    %170 = arith.mulf %167, %151 : vector<2x32xf32>
    %171 = arith.mulf %166, %168 : vector<2x32xf32>
    %172 = arith.addf %170, %171 : vector<2x32xf32>
    %173 = math.tanh %172 : vector<2x32xf32>
    %174 = arith.mulf %169, %173 : vector<2x32xf32>
    %175 = arith.truncf %174 : vector<2x32xf32> to vector<2x32xbf16>
    %c14 = arith.constant 14 : index
    %c0_33 = arith.constant 0 : index
    %176 = vector.load %arg7[%c14, %c0_33] : memref<16x32xbf16, #tpu.memory_space<vmem>>, vector<2x32xbf16>
    tpu.vector_store %arg7[%c14, %c0_33], %175 {strides = array<i32>} : memref<16x32xbf16, #tpu.memory_space<vmem>>, vector<2x32xbf16>,
    %c0_34 = arith.constant 0 : index
    %c0_35 = arith.constant 0 : index
    %177 = vector.load %arg7[%c0_34, %c0_35] : memref<16x32xbf16, #tpu.memory_space<vmem>>, vector<16x32xbf16>
    %c0_36 = arith.constant 0 : index
    %c0_37 = arith.constant 0 : index
    %178 = vector.load %arg4[%c0_36, %c0_37] : memref<32x8xbf16, #tpu.memory_space<vmem>>, vector<32x8xbf16>
    %cst_38 = arith.constant dense<0.000000e+00> : vector<16x8xf32>
    %179 = tpu.matmul %177, %178, %cst_38 {dimension_numbers = #tpu.dot_dimension_numbers<[1], [0], [0], [1], [0, 0, 1, 1], [], []>} : vector<16x32xbf16>, vector<32x8xbf16>, vector<16x8xf32> -> vector<16x8xf32>
    %c0_39 = arith.constant 0 : index
    %c0_40 = arith.constant 0 : index
    %180 = vector.load %arg5[%c0_39, %c0_40] : memref<1x8xf32, #tpu.memory_space<vmem>>, vector<1x8xf32>
    %181 = vector.broadcast %180 : vector<1x8xf32> to vector<16x8xf32>
    %182 = arith.addf %179, %181 : vector<16x8xf32>
    %c0_41 = arith.constant 0 : index
    %c0_42 = arith.constant 0 : index
    %183 = vector.load %arg6[%c0_41, %c0_42] : memref<16x8xf32, #tpu.memory_space<vmem>>, vector<16x8xf32>
    tpu.vector_store %arg6[%c0_41, %c0_42], %182 {strides = array<i32>} : memref<16x8xf32, #tpu.memory_space<vmem>>, vector<16x8xf32>,
    return
  }
}

</mosaic_0001>

<bundles_post_ra>
// kernel: behavior_cloning_lstm.1
= control target key start
LH: loop header
LB: loop body
LE: loop exit
PB: predicated region body
PF: predicated region fallthrough
CT: control target
= control target key end

     0   :  { %v1050_v0 = vmov 0.0   ;;  %vm1051_vm0 = vmmov 0   ;;  %vm46_vm1 = vcmask 130048   ;;  %v1052_v5 = vmov 0   ;;  %s1053_s28 = smov 64   ;;  %s1253_s1 = inlined_call_operand.vmem [shape: bf16[16,128], index: 1, kind: input, shape index: {}]   ;;  %s1254_s2 = inlined_call_operand.vmem [shape: bf16[32,128], index: 2, kind: input, shape index: {}]   ;;  %s1255_s0 = inlined_call_operand.vmem [shape: bf16[16,16], index: 0, kind: input, shape index: {}]   ;;  %s1256_s3 = inlined_call_operand.vmem [shape: f32[1,128], index: 3, kind: input, shape index: {}]   ;;  %s1257_s4 = inlined_call_operand.vmem [shape: bf16[32,8], index: 4, kind: input, shape index: {}]   ;;  %s1258_s5 = inlined_call_operand.vmem [shape: f32[1,8], index: 5, kind: input, shape index: {}]   ;;  %s1259_s6 = inlined_call_operand.vmem [shape: f32[16,8], index: 6, kind: output, shape index: {}]  }
   0x1   :  { %897 = vmatprep.subr.bf16.mxu0 %v1050_v0  ;;  %903 = vmatprep.subr.bf16.mxu1 %v1050_v0  ;;  %v980_v1 = vld [vmem:[%s1253_s1] sm:$0xff]   ;;  %v1111_v4 = vld [vmem:[%s1254_s2 + $0x8] sm:$0xff]   ;;  %vm181_vm2 = vcmask 253952   ;;  %vm107_vm3 = vcmask 261120   ;;  %vm262_vm4 = vcmask 254977   ;;  %vm430_vm5 = vcmask 257027  }
   0x2   :  { %v1098_v2 = vld [vmem:[%s1254_s2] sm:$0xff]   ;;  %899 = vmatprep.mubr.msk.bf16.mxu0 %vm1051_vm0, %v1050_v0  ;;  %907 = vmatprep.mubr.msk.bf16.mxu1 %vm1051_vm0, %v1050_v0  ;;  %vm596_vm6 = vcmask 259077   ;;  %vm346_vm7 = vcmask 256002   ;;  %vm512_vm8 = vcmask 258052   ;;  %vm681_vm9 = vcmask 260102  }
   0x3   :  { %898 = vmatpush3.bf16.msra.mxu0 %v980_v1  ;;  %v982_v3 = vld [vmem:[%s1255_s0] sm:$0xff]   ;;  %904 = vmatpush3.bf16.msra.mxu1 %v1098_v2  ;;  %vm766_vm10 = vcmask 261127   ;;  %vm836_vm11 = vcmask 64512  }
   0x4   :  { %911 = vmatprep.subr.bf16.mxu0 %v1050_v0  ;;  %905 = vmatprep.subr.bf16.mxu1 %v1050_v0  ;;  %v843_v6 = vld [vmem:[%s1256_s3] ss:$0 sm:$0xff]  ;;  %s1054_s3 = smov 32  }
   0x6   :  { %900 = vmatmul.mubr.msk.bf16.vlgmr.msra.gmra.mrb[0].mxu0 %vm46_vm1, %v982_v3 }
   0x7   :  { %912 = vmatpush3.bf16.msra.mxu0 %v1098_v2  ;;  %915 = vmatprep.mubr.msk.bf16.mxu0 %vm1051_vm0, %v1050_v0 }
   0x8   :  { %906 = vmatpush3.bf16.msra.mxu1 %v1111_v4  ;;  %913 = vmatprep.subr.bf16.mxu0 %v1050_v0 }
   0x9   :  { %919 = vmatprep.subr.bf16.mxu1 %v1050_v0 }
   0xb   :  { %908 = vmatmul.mubr.bf16.vlgmr.msra.gmra.mrb[0].mxu1 %v1052_v5  ;;  %914 = vmatpush3.bf16.msra.mxu0 %v1111_v4 }
   0xc   :  { %920 = vmatpush3.bf16.msra.mxu1 %v1098_v2  ;;  %923 = vmatprep.mubr.msk.bf16.mxu1 %vm1051_vm0, %v1050_v0 }
   0xd   :  { %921 = vmatprep.subr.bf16.mxu1 %v1050_v0  ;;  %927 = vmatprep.subr.bf16.mxu0 %v1050_v0 }
  0x10   :  { %922 = vmatpush3.bf16.msra.mxu1 %v1111_v4 }
  0x11   :  { %935 = vmatprep.subr.bf16.mxu1 %v1050_v0 }
  0xd9   :  { %v84_v7 = vpop.f32.mrb[0].mxu0 }
  0xda   :  { %v901_v8 = vpop.f32.mrb[1].mxu0  ;;  %v1132_v9 = vadd.f32 %v843_v6, %v84_v7 }
  0xdb   :  { %v87_v10 = vpop.f32.mrb[2].mxu0 }
  0xdc   :  { %v1134_v11 = vadd.f32 %v843_v6, %v87_v10  ;;  %v902_v12 = vpop.f32.mrb[3].mxu0 }
  0xde   :  { %v145_v13 = vpop.f32.mrb[0].mxu1 }
  0xdf   :  { %v151_v14 = vadd.f32 %v145_v13, %v1132_v9  ;;  %v909_v15 = vpop.f32.mrb[1].mxu1 }
  0xe0   :  { %v148_v16 = vpop.f32.mrb[2].mxu1 }
  0xe1   :  { %986 = vtanh.f32 %v151_v14  ;;  %v910_v17 = vpop.f32.mrb[3].mxu1  ;;  %v849_v19 = vmul.f32 -1.442695, %v151_v14 }
  0xe3   :  { %988 = vpow2.f32 %v849_v19 }
  0xeb   :  { %v987_v18 = vpop.eup %986 }
  0xec   :  { %161 = vrot.lane.b32.xlu0 %v987_v18, %s1053_s28 }
  0xed   :  { %v989_v20 = vpop.eup %988 }
  0xee   :  { %v155_v21 = vadd.f32 1.0, %v989_v20 }
  0xf0   :  { %990 = vrcp.f32 %v155_v21 }
  0xfa   :  { %v991_v22 = vpop.eup %990 }
  0xfb   :  { %v159_v25 = vmul.f32 0.0, %v991_v22 }
 0x15e   :  { %v162_v23 = vpop.permute.xlu0 %161 }
 0x15f   :  { %v164_v24 = vmul.f32 %v991_v22, %v162_v23 }
 0x161   :  { %166 = vrot.lane.b32.xlu0 %v164_v24, %s1054_s3 }
 0x1d3   :  { %v167_v26 = vpop.permute.xlu0 %166 }
 0x1d4   :  { %v169_v27 = vadd.f32 %v167_v26, %v159_v25 }
 0x1d6   :  { %992 = vtanh.f32 %v169_v27  ;;  %v238_v46 = vrot.slane %v169_v27, 6 }
 0x1e0   :  { %v993_v28 = vpop.eup %992 }
 0x1e1   :  { %172 = vrot.lane.b32.xlu1 %v993_v28, %s1053_s28 }
 0x253   :  { %v173_v29 = vpop.permute.xlu1 %172 }
 0x254   :  { %v175_v30 = vmul.f32 %v991_v22, %v173_v29 }
 0x256   :  { %v176_v31 = vpack.c.bf16 %v175_v30, %v175_v30 }
 0x258   :  { %178 = vrot.lane.b32.xlu1 %v176_v31, %s1054_s3 }
 0x2ca   :  { %v179_v32 = vpop.permute.xlu1 %178 }
 0x2cb   :  { %182 = vst.msk [vmem:[#allocation2] sm:$0x1] %vm181_vm2, %v179_v32  ;;  %916 = vmatmul.mubr.msk.bf16.vlgmr.msra.gmra.mrb[4].mxu0 %vm107_vm3, %v179_v32 }
 0x2cc   :  { %928 = vmatpush3.bf16.msra.mxu0 %v1098_v2  ;;  %931 = vmatprep.mubr.msk.bf16.mxu0 %vm1051_vm0, %v1050_v0 }
 0x2cd   :  { %929 = vmatprep.subr.bf16.mxu0 %v1050_v0 }
 0x2d0   :  { %930 = vmatpush3.bf16.msra.mxu0 %v1111_v4 }
 0x2d1   :  { %943 = vmatprep.subr.bf16.mxu0 %v1050_v0 }
 0x39e   :  { %v220_v33 = vpop.f32.mrb[4].mxu0 }
 0x39f   :  { %v227_v34 = vrot.slane %v220_v33, 6  ;;  %v917_v35 = vpop.f32.mrb[5].mxu0 }
 0x3a0   :  { %v223_v36 = vpop.f32.mrb[6].mxu0 }
 0x3a1   :  { %v229_v37 = vadd.f32 %v227_v34, %v1132_v9  ;;  %v918_v38 = vpop.f32.mrb[7].mxu0 }
 0x3a3   :  { %994 = vtanh.f32 %v229_v37  ;;  %v851_v40 = vmul.f32 -1.442695, %v229_v37 }
 0x3a5   :  { %996 = vpow2.f32 %v851_v40 }
 0x3ad   :  { %v995_v39 = vpop.eup %994 }
 0x3ae   :  { %242 = vrot.lane.b32.xlu0 %v995_v39, %s1053_s28 }
 0x3af   :  { %v997_v41 = vpop.eup %996 }
 0x3b0   :  { %v233_v42 = vadd.f32 1.0, %v997_v41 }
 0x3b2   :  { %998 = vrcp.f32 %v233_v42 }
 0x3bc   :  { %v999_v43 = vpop.eup %998 }
 0x3bd   :  { %v240_v47 = vmul.f32 %v999_v43, %v238_v46 }
 0x420   :  { %v243_v44 = vpop.permute.xlu0 %242 }
 0x421   :  { %v245_v45 = vmul.f32 %v999_v43, %v243_v44 }
 0x423   :  { %247 = vrot.lane.b32.xlu1 %v245_v45, %s1054_s3 }
 0x495   :  { %v248_v48 = vpop.permute.xlu1 %247 }
 0x496   :  { %v250_v49 = vadd.f32 %v248_v48, %v240_v47 }
 0x498   :  { %1000 = vtanh.f32 %v250_v49  ;;  %v322_v8 = vrot.slane %v250_v49, 6 }
 0x4a2   :  { %v1001_v50 = vpop.eup %1000 }
 0x4a3   :  { %253 = vrot.lane.b32.xlu0 %v1001_v50, %s1053_s28 }
 0x515   :  { %v254_v51 = vpop.permute.xlu0 %253 }
 0x516   :  { %v256_v52 = vmul.f32 %v999_v43, %v254_v51 }
 0x518   :  { %v1152_v53 = vpack.c.bf16 %v256_v52, %v256_v52 }
 0x51a   :  { %v264_v54 = vrot.slane %v1152_v53, 1 }
 0x51c   :  { %265 = vrot.lane.b32.xlu1 %v264_v54, %s1054_s3 }
 0x58e   :  { %v266_v55 = vpop.permute.xlu1 %265 }
 0x58f   :  { %924 = vmatmul.mubr.msk.bf16.vlgmr.msra.gmra.mrb[4].mxu1 %vm107_vm3, %v266_v55 }
 0x590   :  { %936 = vmatpush3.bf16.msra.mxu1 %v1098_v2  ;;  %939 = vmatprep.mubr.msk.bf16.mxu1 %vm1051_vm0, %v1050_v0 }
 0x591   :  { %937 = vmatprep.subr.bf16.mxu1 %v1050_v0 }
 0x594   :  { %938 = vmatpush3.bf16.msra.mxu1 %v1111_v4 }
 0x595   :  { %951 = vmatprep.subr.bf16.mxu1 %v1050_v0 }
 0x662   :  { %v304_v56 = vpop.f32.mrb[4].mxu1 }
 0x663   :  { %v311_v57 = vrot.slane %v304_v56, 4  ;;  %v925_v58 = vpop.f32.mrb[5].mxu1 }
 0x664   :  { %v307_v59 = vpop.f32.mrb[6].mxu1 }
 0x665   :  { %v313_v60 = vadd.f32 %v311_v57, %v1132_v9  ;;  %v926_v61 = vpop.f32.mrb[7].mxu1 }
 0x667   :  { %1002 = vtanh.f32 %v313_v60  ;;  %v853_v63 = vmul.f32 -1.442695, %v313_v60 }
 0x669   :  { %1004 = vpow2.f32 %v853_v63 }
 0x671   :  { %v1003_v62 = vpop.eup %1002 }
 0x672   :  { %326 = vrot.lane.b32.xlu0 %v1003_v62, %s1053_s28 }
 0x673   :  { %v1005_v1 = vpop.eup %1004 }
 0x674   :  { %v317_v3 = vadd.f32 1.0, %v1005_v1 }
 0x676   :  { %1006 = vrcp.f32 %v317_v3 }
 0x680   :  { %v1007_v5 = vpop.eup %1006 }
 0x681   :  { %v324_v10 = vmul.f32 %v1007_v5, %v322_v8 }
 0x6e4   :  { %v327_v6 = vpop.permute.xlu0 %326 }
 0x6e5   :  { %v329_v7 = vmul.f32 %v1007_v5, %v327_v6 }
 0x6e7   :  { %331 = vrot.lane.b32.xlu1 %v329_v7, %s1054_s3 }
 0x759   :  { %v332_v12 = vpop.permute.xlu1 %331 }
 0x75a   :  { %v334_v13 = vadd.f32 %v332_v12, %v324_v10 }
 0x75c   :  { %1008 = vtanh.f32 %v334_v13  ;;  %v406_v33 = vrot.slane %v334_v13, 6 }
 0x766   :  { %v1009_v14 = vpop.eup %1008 }
 0x767   :  { %337 = vrot.lane.b32.xlu0 %v1009_v14, %s1053_s28 }
 0x7d9   :  { %v338_v15 = vpop.permute.xlu0 %337 }
 0x7da   :  { %v340_v16 = vmul.f32 %v1007_v5, %v338_v15 }
 0x7dc   :  { %v1167_v17 = vpack.c.bf16 %v340_v16, %v340_v16 }
 0x7de   :  { %v348_v18 = vrot.slane %v1167_v17, 2 }
 0x7e0   :  { %349 = vrot.lane.b32.xlu1 %v348_v18, %s1054_s3 }
 0x852   :  { %v350_v19 = vpop.permute.xlu1 %349 }
 0x853   :  { %932 = vmatmul.mubr.msk.bf16.vlgmr.msra.gmra.mrb[8].mxu0 %vm107_vm3, %v350_v19 }
 0x854   :  { %944 = vmatpush3.bf16.msra.mxu0 %v1098_v2  ;;  %947 = vmatprep.mubr.msk.bf16.mxu0 %vm1051_vm0, %v1050_v0 }
 0x855   :  { %945 = vmatprep.subr.bf16.mxu0 %v1050_v0 }
 0x858   :  { %946 = vmatpush3.bf16.msra.mxu0 %v1111_v4 }
 0x859   :  { %959 = vmatprep.subr.bf16.mxu0 %v1050_v0 }
 0x926   :  { %v388_v20 = vpop.f32.mrb[8].mxu0 }
 0x927   :  { %v395_v21 = vrot.slane %v388_v20, 2  ;;  %v933_v22 = vpop.f32.mrb[9].mxu0 }
 0x928   :  { %v391_v23 = vpop.f32.mrb[10].mxu0 }
 0x929   :  { %v397_v24 = vadd.f32 %v395_v21, %v1132_v9  ;;  %v934_v25 = vpop.f32.mrb[11].mxu0 }
 0x92b   :  { %1010 = vtanh.f32 %v397_v24  ;;  %v855_v27 = vmul.f32 -1.442695, %v397_v24 }
 0x92d   :  { %1012 = vpow2.f32 %v855_v27 }
 0x935   :  { %v1011_v26 = vpop.eup %1010 }
 0x936   :  { %410 = vrot.lane.b32.xlu0 %v1011_v26, %s1053_s28 }
 0x937   :  { %v1013_v28 = vpop.eup %1012 }
 0x938   :  { %v401_v29 = vadd.f32 1.0, %v1013_v28 }
 0x93a   :  { %1014 = vrcp.f32 %v401_v29 }
 0x944   :  { %v1015_v30 = vpop.eup %1014 }
 0x945   :  { %v408_v34 = vmul.f32 %v1015_v30, %v406_v33 }
 0x9a8   :  { %v411_v31 = vpop.permute.xlu0 %410 }
 0x9a9   :  { %v413_v32 = vmul.f32 %v1015_v30, %v411_v31 }
 0x9ab   :  { %415 = vrot.lane.b32.xlu1 %v413_v32, %s1054_s3 }
 0xa1d   :  { %v416_v35 = vpop.permute.xlu1 %415 }
 0xa1e   :  { %v418_v36 = vadd.f32 %v416_v35, %v408_v34 }
 0xa20   :  { %1016 = vtanh.f32 %v418_v36  ;;  %v487_v55 = vrot.slane %v418_v36, 6 }
 0xa2a   :  { %v1017_v9 = vpop.eup %1016 }
 0xa2b   :  { %421 = vrot.lane.b32.xlu0 %v1017_v9, %s1053_s28 }
 0xa9d   :  { %v422_v37 = vpop.permute.xlu0 %421 }
 0xa9e   :  { %v424_v38 = vmul.f32 %v1015_v30, %v422_v37 }
 0xaa0   :  { %v1182_v39 = vpack.c.bf16 %v424_v38, %v424_v38 }
 0xaa2   :  { %v432_v40 = vrot.slane %v1182_v39, 3 }
 0xaa4   :  { %433 = vrot.lane.b32.xlu1 %v432_v40, %s1054_s3 }
 0xb16   :  { %v434_v41 = vpop.permute.xlu1 %433 }
 0xb17   :  { %940 = vmatmul.mubr.msk.bf16.vlgmr.msra.gmra.mrb[8].mxu1 %vm107_vm3, %v434_v41 }
 0xb18   :  { %952 = vmatpush3.bf16.msra.mxu1 %v1098_v2  ;;  %955 = vmatprep.mubr.msk.bf16.mxu1 %vm1051_vm0, %v1050_v0 }
 0xb19   :  { %953 = vmatprep.subr.bf16.mxu1 %v1050_v0 }
 0xb1c   :  { %954 = vmatpush3.bf16.msra.mxu1 %v1111_v4 }
 0xb1d   :  { %967 = vmatprep.subr.bf16.mxu1 %v1050_v0 }
 0xbea   :  { %v472_v42 = vpop.f32.mrb[8].mxu1 }
 0xbeb   :  { %v478_v43 = vadd.f32 %v472_v42, %v1134_v11  ;;  %v941_v44 = vpop.f32.mrb[9].mxu1 }
 0xbec   :  { %v475_v45 = vpop.f32.mrb[10].mxu1 }
 0xbed   :  { %1018 = vtanh.f32 %v478_v43  ;;  %v942_v46 = vpop.f32.mrb[11].mxu1  ;;  %v857_v48 = vmul.f32 -1.442695, %v478_v43 }
 0xbef   :  { %1020 = vpow2.f32 %v857_v48 }
 0xbf7   :  { %v1019_v47 = vpop.eup %1018 }
 0xbf8   :  { %491 = vrot.lane.b32.xlu0 %v1019_v47, %s1053_s28 }
 0xbf9   :  { %v1021_v49 = vpop.eup %1020 }
 0xbfa   :  { %v482_v50 = vadd.f32 1.0, %v1021_v49 }
 0xbfc   :  { %1022 = vrcp.f32 %v482_v50 }
 0xc06   :  { %v1023_v51 = vpop.eup %1022 }
 0xc07   :  { %v489_v56 = vmul.f32 %v1023_v51, %v487_v55 }
 0xc6a   :  { %v492_v52 = vpop.permute.xlu0 %491 }
 0xc6b   :  { %v494_v54 = vmul.f32 %v1023_v51, %v492_v52 }
 0xc6d   :  { %496 = vrot.lane.b32.xlu1 %v494_v54, %s1054_s3 }
 0xcdf   :  { %v497_v57 = vpop.permute.xlu1 %496 }
 0xce0   :  { %v499_v58 = vadd.f32 %v497_v57, %v489_v56 }
 0xce2   :  { %1024 = vtanh.f32 %v499_v58 }
 0xcec   :  { %v1025_v59 = vpop.eup %1024 }
 0xced   :  { %502 = vrot.lane.b32.xlu0 %v1025_v59, %s1053_s28 }
 0xd5f   :  { %v503_v60 = vpop.permute.xlu0 %502 }
 0xd60   :  { %v505_v61 = vmul.f32 %v1023_v51, %v503_v60 }
 0xd62   :  { %v1197_v62 = vpack.c.bf16 %v505_v61, %v505_v61 }
 0xd64   :  { %514 = vrot.lane.b32.xlu1 %v1197_v62, %s1054_s3 }
 0xdd6   :  { %v515_v63 = vpop.permute.xlu1 %514 }
 0xdd7   :  { %948 = vmatmul.mubr.msk.bf16.vlgmr.msra.gmra.mrb[12].mxu0 %vm107_vm3, %v515_v63 }
 0xdd8   :  { %960 = vmatpush3.bf16.msra.mxu0 %v1098_v2  ;;  %963 = vmatprep.mubr.msk.bf16.mxu0 %vm1051_vm0, %v1050_v0 }
 0xdd9   :  { %961 = vmatprep.subr.bf16.mxu0 %v1050_v0 }
 0xddc   :  { %962 = vmatpush3.bf16.msra.mxu0 %v1111_v4  ;;  %v571_v4 = vrot.slane %v499_v58, 6 }
 0xeaa   :  { %v553_v1 = vpop.f32.mrb[12].mxu0 }
 0xeab   :  { %v560_v3 = vrot.slane %v553_v1, 6  ;;  %v949_v5 = vpop.f32.mrb[13].mxu0 }
 0xeac   :  { %v556_v6 = vpop.f32.mrb[14].mxu0 }
 0xead   :  { %v562_v7 = vadd.f32 %v560_v3, %v1134_v11  ;;  %v950_v8 = vpop.f32.mrb[15].mxu0 }
 0xeaf   :  { %1026 = vtanh.f32 %v562_v7  ;;  %v859_v12 = vmul.f32 -1.442695, %v562_v7 }
 0xeb1   :  { %1028 = vpow2.f32 %v859_v12 }
 0xeb9   :  { %v1027_v10 = vpop.eup %1026 }
 0xeba   :  { %575 = vrot.lane.b32.xlu0 %v1027_v10, %s1053_s28 }
 0xebb   :  { %v1029_v2 = vpop.eup %1028 }
 0xebc   :  { %v566_v13 = vadd.f32 1.0, %v1029_v2 }
 0xebe   :  { %1030 = vrcp.f32 %v566_v13  ;;  %v984_v13 = vld [vmem:[%s1257_s4] sm:$0xff]  }
 0xec8   :  { %v1031_v14 = vpop.eup %1030 }
 0xec9   :  { %v573_v18 = vmul.f32 %v1031_v14, %v571_v4 }
 0xf2c   :  { %v576_v15 = vpop.permute.xlu0 %575 }
 0xf2d   :  { %v578_v16 = vmul.f32 %v1031_v14, %v576_v15 }
 0xf2f   :  { %580 = vrot.lane.b32.xlu1 %v578_v16, %s1054_s3 }
 0xfa1   :  { %v581_v19 = vpop.permute.xlu1 %580 }
 0xfa2   :  { %v583_v20 = vadd.f32 %v581_v19, %v573_v18 }
 0xfa4   :  { %1032 = vtanh.f32 %v583_v20  ;;  %v656_v40 = vrot.slane %v583_v20, 6 }
 0xfae   :  { %v1033_v21 = vpop.eup %1032 }
 0xfaf   :  { %586 = vrot.lane.b32.xlu0 %v1033_v21, %s1053_s28  ;;  %v864_v21 = vld [vmem:[%s1258_s5] ss:$0 sm:$0xff] }
0x1021   :  { %v587_v22 = vpop.permute.xlu0 %586 }
0x1022   :  { %v589_v23 = vmul.f32 %v1031_v14, %v587_v22  ;;  %v985_v14 = vld [vmem:[%s1257_s4 + $0x8] sm:$0xff]  }
0x1024   :  { %v590_v24 = vpack.c.bf16 %v589_v23, %v589_v23 }
0x1026   :  { %v598_v25 = vrot.slane %v590_v24, 1 }
0x1028   :  { %599 = vrot.lane.b32.xlu1 %v598_v25, %s1054_s3 }
0x109a   :  { %v600_v26 = vpop.permute.xlu1 %599 }
0x109b   :  { %956 = vmatmul.mubr.msk.bf16.vlgmr.msra.gmra.mrb[12].mxu1 %vm107_vm3, %v600_v26 }
0x109c   :  { %971 = vmatprep.mubr.msk.bf16.mxu1 %vm1051_vm0, %v1050_v0  ;;  %968 = vmatpush3.bf16.msra.mxu1 %v984_v13 }
0x109d   :  { %969 = vmatprep.subr.bf16.mxu1 %v1050_v0 }
0x10a0   :  { %970 = vmatpush3.bf16.msra.mxu1 %v985_v14 }
0x116e   :  { %v638_v27 = vpop.f32.mrb[12].mxu1 }
0x116f   :  { %v645_v28 = vrot.slane %v638_v27, 4  ;;  %v957_v29 = vpop.f32.mrb[13].mxu1 }
0x1170   :  { %v641_v30 = vpop.f32.mrb[14].mxu1 }
0x1171   :  { %v647_v31 = vadd.f32 %v645_v28, %v1134_v11  ;;  %v958_v32 = vpop.f32.mrb[15].mxu1 }
0x1173   :  { %1034 = vtanh.f32 %v647_v31  ;;  %v861_v34 = vmul.f32 -1.442695, %v647_v31 }
0x1175   :  { %1036 = vpow2.f32 %v861_v34 }
0x117d   :  { %v1035_v33 = vpop.eup %1034 }
0x117e   :  { %660 = vrot.lane.b32.xlu0 %v1035_v33, %s1053_s28 }
0x117f   :  { %v1037_v35 = vpop.eup %1036 }
0x1180   :  { %v651_v36 = vadd.f32 1.0, %v1037_v35 }
0x1182   :  { %1038 = vrcp.f32 %v651_v36 }
0x118c   :  { %v1039_v9 = vpop.eup %1038 }
0x118d   :  { %v658_v41 = vmul.f32 %v1039_v9, %v656_v40 }
0x11f0   :  { %v661_v37 = vpop.permute.xlu0 %660 }
0x11f1   :  { %v663_v38 = vmul.f32 %v1039_v9, %v661_v37 }
0x11f3   :  { %665 = vrot.lane.b32.xlu1 %v663_v38, %s1054_s3 }
0x1265   :  { %v666_v42 = vpop.permute.xlu1 %665 }
0x1266   :  { %v668_v43 = vadd.f32 %v666_v42, %v658_v41 }
0x1268   :  { %1040 = vtanh.f32 %v668_v43  ;;  %v741_v3 = vrot.slane %v668_v43, 6 }
0x1272   :  { %v1041_v44 = vpop.eup %1040 }
0x1273   :  { %671 = vrot.lane.b32.xlu0 %v1041_v44, %s1053_s28 }
0x12e5   :  { %v672_v45 = vpop.permute.xlu0 %671 }
0x12e6   :  { %v674_v46 = vmul.f32 %v1039_v9, %v672_v45 }
0x12e8   :  { %v675_v47 = vpack.c.bf16 %v674_v46, %v674_v46 }
0x12ea   :  { %v683_v48 = vrot.slane %v675_v47, 2  ;;  %v677_v2 = vrot.slane %v675_v47, 4 }
0x12ec   :  { %684 = vrot.lane.b32.xlu1 %v683_v48, %s1054_s3 }
0x135e   :  { %v685_v49 = vpop.permute.xlu1 %684 }
0x135f   :  { %964 = vmatmul.mubr.msk.bf16.vlgmr.msra.gmra.mrb[16].mxu0 %vm107_vm3, %v685_v49 }
0x1432   :  { %v723_v50 = vpop.f32.mrb[16].mxu0 }
0x1433   :  { %v730_v51 = vrot.slane %v723_v50, 2  ;;  %v965_v52 = vpop.f32.mrb[17].mxu0 }
0x1434   :  { %v726_v54 = vpop.f32.mrb[18].mxu0 }
0x1435   :  { %v732_v55 = vadd.f32 %v730_v51, %v1134_v11  ;;  %v966_v56 = vpop.f32.mrb[19].mxu0  ;;  %v592_v11 = vrot.slane %v590_v24, 4 }
0x1437   :  { %1042 = vtanh.f32 %v732_v55  ;;  %v863_v58 = vmul.f32 -1.442695, %v732_v55 }
0x1439   :  { %1044 = vpow2.f32 %v863_v58 }
0x1441   :  { %v1043_v57 = vpop.eup %1042 }
0x1442   :  { %745 = vrot.lane.b32.xlu0 %v1043_v57, %s1053_s28 }
0x1443   :  { %v1045_v59 = vpop.eup %1044 }
0x1444   :  { %v736_v60 = vadd.f32 1.0, %v1045_v59 }
0x1446   :  { %1046 = vrcp.f32 %v736_v60 }
0x1450   :  { %v1047_v61 = vpop.eup %1046 }
0x1451   :  { %v743_v5 = vmul.f32 %v1047_v61, %v741_v3 }
0x14b4   :  { %v746_v63 = vpop.permute.xlu0 %745 }
0x14b5   :  { %v748_v1 = vmul.f32 %v1047_v61, %v746_v63 }
0x14b7   :  { %750 = vrot.lane.b32.xlu1 %v748_v1, %s1054_s3 }
0x14bb   :  { %259 = vrot.lane.b32.xlu1 %v1152_v53, %s1054_s3 }
0x14bf   :  { %427 = vrot.lane.b32.xlu1 %v1182_v39, %s1054_s3  ;;  %v508_v39 = vrot.slane %v1197_v62, 4 }
0x14c3   :  { %593 = vrot.lane.b32.xlu1 %v592_v11, %s1054_s3 }
0x1529   :  { %v751_v6 = vpop.permute.xlu1 %750 }
0x152a   :  { %v753_v7 = vadd.f32 %v751_v6, %v743_v5 }
0x152c   :  { %1048 = vtanh.f32 %v753_v7 }
0x152d   :  { %v260_v8 = vpop.permute.xlu1 %259 }
0x152e   :  { %263 = vst.msk [vmem:[#allocation2] sm:$0x2] %vm262_vm4, %v260_v8 }
0x1531   :  { %v428_v10 = vpop.permute.xlu1 %427 }
0x1532   :  { %431 = vst.msk [vmem:[#allocation2] sm:$0x8] %vm430_vm5, %v428_v10 }
0x1535   :  { %v594_v12 = vpop.permute.xlu1 %593 }
0x1536   :  { %v1049_v53 = vpop.eup %1048  ;;  %597 = vst.msk [vmem:[#allocation2] sm:$0x20] %vm596_vm6, %v594_v12 }
0x1537   :  { %756 = vrot.lane.b32.xlu0 %v1049_v53, %s1053_s28 }
0x153b   :  { %343 = vrot.lane.b32.xlu0 %v1167_v17, %s1054_s3 }
0x153f   :  { %509 = vrot.lane.b32.xlu0 %v508_v39, %s1054_s3 }
0x1543   :  { %678 = vrot.lane.b32.xlu0 %v677_v2, %s1054_s3 }
0x15a9   :  { %v757_v17 = vpop.permute.xlu0 %756 }
0x15aa   :  { %v759_v15 = vmul.f32 %v1047_v61, %v757_v17 }
0x15ac   :  { %v760_v62 = vpack.c.bf16 %v759_v15, %v759_v15 }
0x15ad   :  { %v344_v16 = vpop.permute.xlu0 %343 }
0x15ae   :  { %v762_v4 = vrot.slane %v760_v62, 4  ;;  %347 = vst.msk [vmem:[#allocation2] sm:$0x4] %vm346_vm7, %v344_v16 }
0x15b0   :  { %763 = vrot.lane.b32.xlu1 %v762_v4, %s1054_s3 }
0x15b1   :  { %v510_v18 = vpop.permute.xlu0 %509 }
0x15b2   :  { %513 = vst.msk [vmem:[#allocation2] sm:$0x10] %vm512_vm8, %v510_v18 }
0x15b5   :  { %v679_v19 = vpop.permute.xlu0 %678 }
0x15b6   :  { %682 = vst.msk [vmem:[#allocation2] sm:$0x40] %vm681_vm9, %v679_v19 }
0x1622   :  { %v764_v20 = vpop.permute.xlu1 %763 }
0x1623   :  { %767 = vst.msk [vmem:[#allocation2] sm:$0x80] %vm766_vm10, %v764_v20 }
0x162a   :  { %v768_v0 = vld [vmem:[#allocation2] sm:$0xff] }
0x162b   :  { %972 = vmatmul.mubr.msk.bf16.vlgmr.msra.gmra.mrb[16].mxu1 %vm107_vm3, %v768_v0 }
0x16fe   :  { %v829_v22 = vpop.f32.mrb[16].mxu1 }
0x16ff   :  { %v830_v23 = vadd.f32 %v864_v21, %v829_v22  ;;  %v973_v24 = vpop.f32.mrb[17].mxu1 }
0x1700   :  { %v832_v25 = vpop.f32.mrb[18].mxu1 }
0x1701   :  { %837 = vst.msk [vmem:[%s1259_s6] sm:$0xff] %vm836_vm11, %v830_v23  ;;  %v833_v26 = vadd.f32 %v864_v21, %v832_v25  ;;  %v974_v27 = vpop.f32.mrb[19].mxu1 }
0x1703   :  { %838 = vst.msk [vmem:[%s1259_s6 + $0x8] sm:$0xff] %vm836_vm11, %v833_v26 }

</bundles_post_ra>
